<compile_context>
chip_gen: v6e
topology: v6e:2x2x1
jax: 0.10.0
libtpu: 0.0.40
codegen_flags: <defaults>
</compile_context>

<pallas_src>
import functools

import jax
import jax.numpy as jnp
from jax import lax
from jax.experimental import pallas as pl
from jax.experimental.pallas import tpu as pltpu


# ---------------------------------------------------------------------------
# Pallas kernel: tiled masked Gram accumulation + per-batch squared-error sum
# ---------------------------------------------------------------------------
def _style_loss_kernel(x_ref, t_ref, tgt_ref, loss_ref, gram_acc, *, m, inv_norm):
    k = pl.program_id(1)  # spatial-tile index (reduction axis, last in grid)

    @pl.when(k == 0)
    def _init():
        gram_acc[...] = jnp.zeros_like(gram_acc)

    x = x_ref[0]            # (b, tn)  feature tile of batch element i
    t_all = t_ref[...]      # (m, tn)  all masks for this spatial tile

    # Reuse the x tile across every mask (x is read from HBM once per tile).
    for j in range(m):
        masked = x * t_all[j][None, :]                      # (b, tn), input dtype
        # Gram contribution on the MXU: contract the lane dim of BOTH operands
        # (A @ A^T) -- no transpose materialized, f32 accumulation.
        gram_acc[j] += lax.dot_general(
            masked, masked,
            dimension_numbers=(((1,), (1,)), ((), ())),
            preferred_element_type=jnp.float32)

    # Finalize: normalize, diff against the (resident, un-broadcast) target and
    # emit this batch element's partial squared-error sum.
    @pl.when(k == pl.num_programs(1) - 1)
    def _finalize():
        g = gram_acc[...] * inv_norm                        # (m, b, b) f32
        diff = g - tgt_ref[...].astype(jnp.float32)
        loss_ref[...] = jnp.sum(diff * diff, axis=(0, 1, 2), keepdims=True)


# ---------------------------------------------------------------------------
# Tile-size / VMEM budgeting helper
# ---------------------------------------------------------------------------
def _choose_tile(n, b, m, itemsize, tile_budget_bytes=20 * 2**20):
    """Pick a lane-dense spatial tile tn (multiple of 128) under a VMEM budget."""
    n128 = ((n + 127) // 128) * 128
    per_col = 2 * (b + m) * itemsize            # double-buffered x + mask columns
    max_tn = max(128, (tile_budget_bytes // per_col) // 128 * 128)
    tn = min(n128, max_tn)
    num_k = -(-n128 // tn)
    return tn, num_k, num_k * tn                # (tile, grid extent, padded n)


# ---------------------------------------------------------------------------
# Wrapper: reshape / pad glue + pallas_call
# ---------------------------------------------------------------------------
def masked_gram_style_loss(x_input, mask, target):
    """x_input: (a,b,c,d) features; mask: (m,c,d); target: (1,m,b,b) or (m,b,b).

    Returns the scalar MSE between the masked Gram matrices of x_input and the
    target Gram matrices (matching the PyTorch StyleLoss.forward semantics).
    """
    a, b, c, d = x_input.shape
    m = mask.shape[0]
    n = c * d

    dtype = x_input.dtype                       # bf16 inputs supported as-is
    itemsize = jnp.dtype(dtype).itemsize
    tn, num_k, n_pad = _choose_tile(n, b, m, itemsize)

    x_flat = x_input.reshape(a, b, n)
    t_flat = mask.reshape(m, n).astype(dtype)
    if n_pad != n:                              # zero padding: no Gram contribution
        x_flat = jnp.pad(x_flat, ((0, 0), (0, 0), (0, n_pad - n)))
        t_flat = jnp.pad(t_flat, ((0, 0), (0, n_pad - n)))
    tgt = target.reshape(m, b, b).astype(jnp.float32)

    kernel = functools.partial(
        _style_loss_kernel, m=m, inv_norm=1.0 / float(b * c * d))

    # VMEM: double-buffered input tiles + resident target/scratch, with margin.
    tile_bytes = 2 * (b + m) * tn * itemsize
    resident_bytes = 4 * m * b * b * 4
    vmem_limit = int(min(48 * 2**20,
                         max(32 * 2**20, 2 * tile_bytes + resident_bytes + (4 << 20))))

    loss_partials = pl.pallas_call(
        kernel,
        out_shape=jax.ShapeDtypeStruct((a, 1, 1), jnp.float32),
        grid=(a, num_k),
        in_specs=[
            pl.BlockSpec((1, b, tn), lambda i, k: (i, 0, k)),   # features tile
            pl.BlockSpec((m, tn), lambda i, k: (0, k)),         # all masks, this tile
            pl.BlockSpec((m, b, b), lambda i, k: (0, 0, 0)),    # target Grams (resident)
        ],
        out_specs=pl.BlockSpec((1, 1, 1), lambda i, k: (i, 0, 0)),  # per-batch partial
        scratch_shapes=[pltpu.VMEM((m, b, b), jnp.float32)],        # Gram accumulator
        compiler_params=pltpu.CompilerParams(
            dimension_semantics=("parallel", "arbitrary"),
            vmem_limit_bytes=vmem_limit,
        ),
    )(x_flat, t_flat, tgt)

    # MSE over the (a, m, b, b) Gram tensor.
    return jnp.sum(loss_partials) / float(a * m * b * b)


# ---------------------------------------------------------------------------
# Module setup (plain JAX glue, matches PyTorch target_gram semantics)
# ---------------------------------------------------------------------------
def target_gram(target_feature, mask):
    """target_feature: (m,b,c,d); mask: (m,c,d) -> (1,m,b,b)."""
    m, b, c, d = target_feature.shape
    masked = target_feature * mask[:, None, :, :]
    mf = masked.reshape(m, b, c * d)
    G = jnp.einsum("mik,mjk->mij", mf, mf) / float(b * c * d)
    return G[None]


class StyleLoss:
    """JAX/Pallas port of the PyTorch StyleLoss module."""

    def __init__(self, target_feature, mask):
        self.mask = mask
        self.target = target_gram(target_feature, mask)  # (1, m, b, b)
        self.loss = 0.0

    def forward(self, x_input):
        self.loss = masked_gram_style_loss(x_input, self.mask, self.target)
        return x_input  # same semantics as the PyTorch module


# ---------------------------------------------------------------------------
# Pure-JAX reference (mirrors torch gram_matrix) for a sanity check
# ---------------------------------------------------------------------------
def _gram_matrix_ref(x, T):
    a, b, c, d = x.shape
    masked = jnp.einsum("abcd,mcd->ambcd", x, T)
    mf = masked.reshape(a, T.shape[0], b, c * d)
    G = jnp.einsum("amik,amjk->amij", mf, mf)
    return G / float(b * c * d)


if __name__ == "__main__":
    # Small shapes consistent with the module's forward.
    a, b, c, d = 2, 4, 16, 16   # batch, channels, H, W
    m = 3                       # number of spatial-control masks

    key = jax.random.PRNGKey(0)
    k1, k2, k3 = jax.random.split(key, 3)
    x_input = jax.random.normal(k1, (a, b, c, d), dtype=jnp.float32)
    target_feature = jax.random.normal(k2, (m, b, c, d), dtype=jnp.float32)
    mask = jax.random.uniform(k3, (m, c, d), dtype=jnp.float32)

    module = StyleLoss(target_feature, mask)
    out = module.forward(x_input)
    out = jax.block_until_ready(out)
    loss = jax.block_until_ready(module.loss)

    # Sanity check against the pure-JAX reference (f32 path).
    G_ref = _gram_matrix_ref(x_input, mask)
    tgt_ref = jnp.broadcast_to(module.target, G_ref.shape)
    loss_ref = jnp.mean((G_ref - tgt_ref) ** 2)
    assert jnp.allclose(loss, loss_ref, rtol=1e-4, atol=1e-6), (loss, loss_ref)

    # bf16 feature path (halved HBM traffic); f32 MXU accumulation keeps the
    # result close to the f32 reference.
    loss_bf16 = jax.block_until_ready(
        masked_gram_style_loss(x_input.astype(jnp.bfloat16), mask, module.target))
    assert jnp.isfinite(loss_bf16)
    assert abs(float(loss_bf16) - float(loss_ref)) <= 0.05 * abs(float(loss_ref)) + 1e-8

    print("KERNEL_OK")
</pallas_src>

<mosaic_0001>
module attributes {stable_mosaic.version = 11 : i64} {
  func.func @_style_loss_kernel(%arg0: i32, %arg1: i32, %arg2: memref<1x4x256xf32, #tpu.memory_space<vmem>>, %arg3: memref<3x256xf32, #tpu.memory_space<vmem>>, %arg4: memref<3x4x4xf32, #tpu.memory_space<vmem>>, %arg5: memref<1x1x1xf32, #tpu.memory_space<vmem>>, %arg6: memref<3x4x4xf32, #tpu.memory_space<vmem>>) attributes {dimension_semantics = [#tpu.dimension_semantics<parallel>, #tpu.dimension_semantics<arbitrary>], iteration_bounds = array<i64: 2, 1>, scalar_prefetch = 0 : i64, scratch_operands = 1 : i64, tpu.core_type = #tpu.core_type<tc>, window_params = [{transform_indices = @transform_0, window_bounds = array<i64: 1, 4, 256>}, {transform_indices = @transform_1, window_bounds = array<i64: 3, 256>}, {pipeline_mode = #tpu.pipeline_mode<synchronous>, transform_indices = @transform_2, window_bounds = array<i64: 3, 4, 4>}, {transform_indices = @transform_3, window_bounds = array<i64: 1, 1, 1>}]} {
    %c0_i32 = arith.constant 0 : i32
    %0 = arith.cmpi eq, %arg1, %c0_i32 : i32
    %1 = arith.extui %0 : i1 to i32
    %c0_i32_0 = arith.constant 0 : i32
    %2 = arith.cmpi ne, %1, %c0_i32_0 : i32
    scf.if %2 {
      %cst_25 = arith.constant 0.000000e+00 : f32
      %45 = vector.broadcast %cst_25 : f32 to vector<3x4x4xf32>
      %c0_26 = arith.constant 0 : index
      %c0_27 = arith.constant 0 : index
      %c0_28 = arith.constant 0 : index
      %46 = vector.load %arg6[%c0_26, %c0_27, %c0_28] : memref<3x4x4xf32, #tpu.memory_space<vmem>>, vector<3x4x4xf32>
      tpu.vector_store %arg6[%c0_26, %c0_27, %c0_28], %45 {strides = array<i32>} : memref<3x4x4xf32, #tpu.memory_space<vmem>>, vector<3x4x4xf32>,
    } else {
    }
    %c0 = arith.constant 0 : index
    %c0_1 = arith.constant 0 : index
    %c0_2 = arith.constant 0 : index
    %3 = vector.load %arg2[%c0, %c0_1, %c0_2] : memref<1x4x256xf32, #tpu.memory_space<vmem>>, vector<1x4x256xf32>
    %4 = vector.shape_cast %3 : vector<1x4x256xf32> to vector<4x256xf32>
    %c0_3 = arith.constant 0 : index
    %c0_4 = arith.constant 0 : index
    %5 = vector.load %arg3[%c0_3, %c0_4] : memref<3x256xf32, #tpu.memory_space<vmem>>, vector<3x256xf32>
    %6 = vector.extract_strided_slice %5 {offsets = [0, 0], sizes = [1, 256], strides = [1, 1]} : vector<3x256xf32> to vector<1x256xf32>
    %7 = vector.shape_cast %6 : vector<1x256xf32> to vector<256xf32>
    %8 = vector.shape_cast %7 : vector<256xf32> to vector<1x256xf32>
    %9 = vector.broadcast %8 : vector<1x256xf32> to vector<4x256xf32>
    %10 = arith.mulf %4, %9 : vector<4x256xf32>
    %c0_5 = arith.constant 0 : index
    %c0_6 = arith.constant 0 : index
    %c0_7 = arith.constant 0 : index
    %11 = vector.load %arg6[%c0_5, %c0_6, %c0_7] : memref<3x4x4xf32, #tpu.memory_space<vmem>>, vector<1x4x4xf32>
    %12 = vector.shape_cast %11 : vector<1x4x4xf32> to vector<4x4xf32>
    %cst = arith.constant dense<0.000000e+00> : vector<4x4xf32>
    %13 = tpu.matmul %10, %10, %cst {dimension_numbers = #tpu.dot_dimension_numbers<[1], [1], [0], [0], [0, 0, 1, 0], [], []>} : vector<4x256xf32>, vector<4x256xf32>, vector<4x4xf32> -> vector<4x4xf32>
    %14 = arith.addf %12, %13 : vector<4x4xf32>
    %c0_8 = arith.constant 0 : index
    %c0_9 = arith.constant 0 : index
    %c0_10 = arith.constant 0 : index
    %15 = vector.load %arg6[%c0_8, %c0_9, %c0_10] : memref<3x4x4xf32, #tpu.memory_space<vmem>>, vector<1x4x4xf32>
    %16 = vector.shape_cast %15 : vector<1x4x4xf32> to vector<4x4xf32>
    %17 = vector.shape_cast %14 : vector<4x4xf32> to vector<1x4x4xf32>
    tpu.vector_store %arg6[%c0_8, %c0_9, %c0_10], %17 {strides = array<i32>} : memref<3x4x4xf32, #tpu.memory_space<vmem>>, vector<1x4x4xf32>,
    %18 = vector.extract_strided_slice %5 {offsets = [1, 0], sizes = [1, 256], strides = [1, 1]} : vector<3x256xf32> to vector<1x256xf32>
    %19 = vector.shape_cast %18 : vector<1x256xf32> to vector<256xf32>
    %20 = vector.shape_cast %19 : vector<256xf32> to vector<1x256xf32>
    %21 = vector.broadcast %20 : vector<1x256xf32> to vector<4x256xf32>
    %22 = arith.mulf %4, %21 : vector<4x256xf32>
    %c1 = arith.constant 1 : index
    %c0_11 = arith.constant 0 : index
    %c0_12 = arith.constant 0 : index
    %23 = vector.load %arg6[%c1, %c0_11, %c0_12] : memref<3x4x4xf32, #tpu.memory_space<vmem>>, vector<1x4x4xf32>
    %24 = vector.shape_cast %23 : vector<1x4x4xf32> to vector<4x4xf32>
    %cst_13 = arith.constant dense<0.000000e+00> : vector<4x4xf32>
    %25 = tpu.matmul %22, %22, %cst_13 {dimension_numbers = #tpu.dot_dimension_numbers<[1], [1], [0], [0], [0, 0, 1, 0], [], []>} : vector<4x256xf32>, vector<4x256xf32>, vector<4x4xf32> -> vector<4x4xf32>
    %26 = arith.addf %24, %25 : vector<4x4xf32>
    %c1_14 = arith.constant 1 : index
    %c0_15 = arith.constant 0 : index
    %c0_16 = arith.constant 0 : index
    %27 = vector.load %arg6[%c1_14, %c0_15, %c0_16] : memref<3x4x4xf32, #tpu.memory_space<vmem>>, vector<1x4x4xf32>
    %28 = vector.shape_cast %27 : vector<1x4x4xf32> to vector<4x4xf32>
    %29 = vector.shape_cast %26 : vector<4x4xf32> to vector<1x4x4xf32>
    tpu.vector_store %arg6[%c1_14, %c0_15, %c0_16], %29 {strides = array<i32>} : memref<3x4x4xf32, #tpu.memory_space<vmem>>, vector<1x4x4xf32>,
    %30 = vector.extract_strided_slice %5 {offsets = [2, 0], sizes = [1, 256], strides = [1, 1]} : vector<3x256xf32> to vector<1x256xf32>
    %31 = vector.shape_cast %30 : vector<1x256xf32> to vector<256xf32>
    %32 = vector.shape_cast %31 : vector<256xf32> to vector<1x256xf32>
    %33 = vector.broadcast %32 : vector<1x256xf32> to vector<4x256xf32>
    %34 = arith.mulf %4, %33 : vector<4x256xf32>
    %c2 = arith.constant 2 : index
    %c0_17 = arith.constant 0 : index
    %c0_18 = arith.constant 0 : index
    %35 = vector.load %arg6[%c2, %c0_17, %c0_18] : memref<3x4x4xf32, #tpu.memory_space<vmem>>, vector<1x4x4xf32>
    %36 = vector.shape_cast %35 : vector<1x4x4xf32> to vector<4x4xf32>
    %cst_19 = arith.constant dense<0.000000e+00> : vector<4x4xf32>
    %37 = tpu.matmul %34, %34, %cst_19 {dimension_numbers = #tpu.dot_dimension_numbers<[1], [1], [0], [0], [0, 0, 1, 0], [], []>} : vector<4x256xf32>, vector<4x256xf32>, vector<4x4xf32> -> vector<4x4xf32>
    %38 = arith.addf %36, %37 : vector<4x4xf32>
    %c2_20 = arith.constant 2 : index
    %c0_21 = arith.constant 0 : index
    %c0_22 = arith.constant 0 : index
    %39 = vector.load %arg6[%c2_20, %c0_21, %c0_22] : memref<3x4x4xf32, #tpu.memory_space<vmem>>, vector<1x4x4xf32>
    %40 = vector.shape_cast %39 : vector<1x4x4xf32> to vector<4x4xf32>
    %41 = vector.shape_cast %38 : vector<4x4xf32> to vector<1x4x4xf32>
    tpu.vector_store %arg6[%c2_20, %c0_21, %c0_22], %41 {strides = array<i32>} : memref<3x4x4xf32, #tpu.memory_space<vmem>>, vector<1x4x4xf32>,
    %c0_i32_23 = arith.constant 0 : i32
    %42 = arith.cmpi eq, %arg1, %c0_i32_23 : i32
    %43 = arith.extui %42 : i1 to i32
    %c0_i32_24 = arith.constant 0 : i32
    %44 = arith.cmpi ne, %43, %c0_i32_24 : i32
    scf.if %44 {
      %c0_25 = arith.constant 0 : index
      %c0_26 = arith.constant 0 : index
      %c0_27 = arith.constant 0 : index
      %45 = vector.load %arg6[%c0_25, %c0_26, %c0_27] : memref<3x4x4xf32, #tpu.memory_space<vmem>>, vector<3x4x4xf32>
      %cst_28 = arith.constant 9.765625E-4 : f32
      %46 = vector.broadcast %cst_28 : f32 to vector<3x4x4xf32>
      %47 = arith.mulf %45, %46 : vector<3x4x4xf32>
      %c0_29 = arith.constant 0 : index
      %c0_30 = arith.constant 0 : index
      %c0_31 = arith.constant 0 : index
      %48 = vector.load %arg4[%c0_29, %c0_30, %c0_31] : memref<3x4x4xf32, #tpu.memory_space<vmem>>, vector<3x4x4xf32>
      %49 = arith.subf %47, %48 : vector<3x4x4xf32>
      %50 = arith.mulf %49, %49 : vector<3x4x4xf32>
      %51 = vector.shape_cast %50 : vector<3x4x4xf32> to vector<1x3x4x4xf32>
      %cst_32 = arith.constant dense<0.000000e+00> : vector<1xf32>
      %52 = vector.multi_reduction <add>, %51, %cst_32 [1, 2, 3] : vector<1x3x4x4xf32> to vector<1xf32>
      %53 = vector.shape_cast %52 : vector<1xf32> to vector<1x1x1x1xf32>
      %54 = vector.extract %53[0, 0, 0, 0] : f32 from vector<1x1x1x1xf32>
      %55 = vector.broadcast %54 : f32 to vector<1x1x1xf32>
      %c0_33 = arith.constant 0 : index
      %c0_34 = arith.constant 0 : index
      %c0_35 = arith.constant 0 : index
      %56 = vector.load %arg5[%c0_33, %c0_34, %c0_35] : memref<1x1x1xf32, #tpu.memory_space<vmem>>, vector<1x1x1xf32>
      tpu.vector_store %arg5[%c0_33, %c0_34, %c0_35], %55 {strides = array<i32>} : memref<1x1x1xf32, #tpu.memory_space<vmem>>, vector<1x1x1xf32>,
    } else {
    }
    return
  }
  func.func @transform_0(%arg0: i32, %arg1: i32) -> (i32, i32, i32) {
    %c0_i32 = arith.constant 0 : i32
    %c0_i32_0 = arith.constant 0 : i32
    return %arg0, %c0_i32, %arg1 : i32, i32, i32
  }
  func.func @transform_1(%arg0: i32, %arg1: i32) -> (i32, i32) {
    %c0_i32 = arith.constant 0 : i32
    %c0_i32_0 = arith.constant 0 : i32
    return %c0_i32, %arg1 : i32, i32
  }
  func.func @transform_2(%arg0: i32, %arg1: i32) -> (i32, i32, i32) {
    %c0_i32 = arith.constant 0 : i32
    %c0_i32_0 = arith.constant 0 : i32
    %c0_i32_1 = arith.constant 0 : i32
    %c0_i32_2 = arith.constant 0 : i32
    return %c0_i32, %c0_i32_0, %c0_i32_1 : i32, i32, i32
  }
  func.func @transform_3(%arg0: i32, %arg1: i32) -> (i32, i32, i32) {
    %c0_i32 = arith.constant 0 : i32
    %c0_i32_0 = arith.constant 0 : i32
    %c0_i32_1 = arith.constant 0 : i32
    return %arg0, %c0_i32, %c0_i32_0 : i32, i32, i32
  }
}

</mosaic_0001>

<bundles_post_ra>
// kernel: tpu_custom_call.1
= control target key start
LH: loop header
LB: loop body
LE: loop exit
PB: predicated region body
PF: predicated region fallthrough
CT: control target
= control target key end

     0   :  { %8 = vsyncpa [#allocation4], 0  ;;  %s1080_s0 = inlined_call_operand.hbm [shape: f32[2,4,256], index: 0, kind: input, shape index: {}]   ;;  %s1081_s1 = inlined_call_operand.hbm [shape: f32[3,256], index: 1, kind: input, shape index: {}]   ;;  %s1082_s2 = inlined_call_operand.hbm [shape: f32[3,4,4], index: 2, kind: input, shape index: {}]   ;;  %s1083_s3 = inlined_call_operand.vmem [shape: f32[2,1,1], index: 3, kind: output, shape index: {}]  }
   0x1   :  { %10 = vsyncpa [#allocation4 + $0x1], 0 }
   0x2   :  { %11 = vsyncpa [#allocation6], 0  ;;  %s934_s12 = smov 0   ;;  %s936_s13 = smov 0  }
   0x3   :  { %s938_s14 = smov 0   ;;  %s940_s15 = smov 0  }
   0x4   :  { %s942_s16 = smov 0   ;;  %s944_s17 = smov 0  }
   0x5 LB: > { %s675_s18 = sadd.s32 4294967295, %s906_s17   ;;  %p51_p0 = scmp.ne.s32.totalorder %s890_s13, %s886_s12  ;;  %s906_s17 = sphi %s944_s17, %s17_s17   ;;  %s902_s16 = sphi %s942_s16, %s1100_s16   ;;  %s898_s15 = sphi %s940_s15, %s1099_s15   ;;  %s894_s14 = sphi %s938_s14, %s1098_s14   ;;  %s890_s13 = sphi %s936_s13, %s1097_s13   ;;  %s886_s12 = sphi %s934_s12, %s1096_s12  }
   0x6   : > { %p964_p1 = scmp.eq.s32.totalorder %s675_s18, 0  ;;  %p677_p2 = scmp.ge.s32.totalorder %s906_s17, 1 }
   0x7   : > { %p135_p3 = scmp.lt.s32.totalorder %s906_s17, 3  ;;  %s908_s22 = smov [#allocation5]  }
   0x8   : > { %s1088_s19 = scalar_select %p964_p1, 1, 0 }
   0x9   : > { %p972_p4 = por %p964_p1, %p51_p0  ;;  %p976_p5 = pnand %p677_p2, %p135_p3 }
   0xa   : > { %s151_s23 = sshll.u32 %s908_s22, 4  ;;  %s909_s24 = smov [#allocation7]   ;;  %s152_s23 = int_to_ptr.vmem [resolvable:$true] %s151_s23 }
   0xb   : > { %s1089_s20 = scalar_select %p972_p4, 1, 0 }
   0xc   : > { %s1090_s21 = scalar_select %p976_p5, 1, 0 }
   0xd   : > { %p703_p6 = pneg %p976_p5  ;;  %s161_s25 = sshll.u32 %s909_s24, 4  ;;  %s162_s25 = int_to_ptr.vmem [resolvable:$true] %s161_s25 }
   0xe   : > { %s783_s27 = scalar_lea.vmem %s152_s23, 128  ;;  %p791_p12 = scmp.lt.s32.totalorder %s152_s23, %s152_s23 }
   0xf   : > { %p984_p7 = pnand %p703_p6, %p964_p1  ;;  %p784_p9 = scmp.ne.s32.totalorder %s152_s23, %s783_s27 }
  0x10   : > { %p792_p13 = scmp.lt.s32.totalorder %s783_s27, %s783_s27 }
  0x11   : > { %p774_p8 = pneg %p984_p7 }
  0x12   : > { %p793_p0 = por %p792_p13, %p791_p12 }
  0x13   : > { %p786_p10 = pnand %p784_p9, %p774_p8 }
  0x15   : > { %p787_p11 = pneg %p786_p10 }
  0x17   : > { %p794_p2 = pnand %p793_p0, %p787_p11 }
  0x19   : > { %797 = shalt.err (!%p794_p2)
}
  0x1a   : > { %706 = dma.hbm_to_vmem [thread:$0]  (!%p984_p7), %s1081_s1, 128, %s152_s23, [#allocation6]  }
  0x1b   : > { %s809_s30 = scalar_lea.vmem %s162_s25, 192  ;;  %p817_p9 = scmp.lt.s32.totalorder %s162_s25, %s162_s25 }
  0x1c   : > { %p810_p3 = scmp.ne.s32.totalorder %s162_s25, %s809_s30  ;;  %p818_p10 = scmp.lt.s32.totalorder %s809_s30, %s809_s30 }
  0x1e   : > { %p812_p6 = pnand %p810_p3, %p774_p8  ;;  %p819_p4 = por %p818_p10, %p817_p9 }
  0x20   : > { %p813_p1 = pneg %p812_p6 }
  0x22   : > { %p820_p5 = pnand %p819_p4, %p813_p1 }
  0x24   : > { %823 = shalt.err (!%p820_p5)
}
  0x25   : > { %s910_s4 = smov 64   ;;  %s911_s5 = smov 4  }
  0x26   : > { %709 = dma.hbm_to_vmem [thread:$0]  (!%p984_p7), %s1082_s2, 192, %s162_s25, [#allocation6], %s910_s4, %s910_s4, %s911_s5  }
  0x27   : > { %s29_s8 = sadd.s32 1, %s902_s16  ;;  %s38_s9 = sadd.s32 1, %s894_s14 }
  0x28   : > { %p31_p1 = scmp.ge.s32.totalorder %s29_s8, 2  ;;  %p45_p4 = scmp.ne.s32.totalorder %s894_s14, %s890_s13 }
  0x29   : > { %p46_p5 = scmp.eq.s32.totalorder %s906_s17, 0  ;;  %p716_p8 = scmp.lt.s32.totalorder %s906_s17, 2 }
  0x2a   : > { %s1102_s8 = smov (%p31_p1, %s29_s8), 0  ;;  %s175_s10 = sand.u32 1, %s894_s14  }
  0x2b   : > { %p47_p11 = por %p46_p5, %p45_p4  ;;  %s33_s11 = ssub.s32 %s902_s16, %s1102_s8 }
  0x2c   : > { %p36_p12 = scmp.eq.s32.totalorder %s33_s11, 0  ;;  %s681_s12 = sshll.u32 %s175_s10, 3 }
  0x2d   : > { %s690_s18 = sshll.u32 %s902_s16, 7  ;;  %s179_s26 = scalar_lea.vmem [#allocation3], %s681_s12 }
  0x2e   : > { %s1019_s22 = scalar_select %p36_p12, %s894_s14, %s38_s9  }
  0x2f   : > { %s187_s25 = scalar_lea.hbm %s1080_s0, %s690_s18  ;;  %s189_s27 = sshll.u32 %s179_s26, 4  ;;  %s190_s27 = int_to_ptr.vmem [resolvable:$true] %s189_s27 }
  0x30   : > { %p1026_p7 = pnand %p716_p8, %p47_p11  ;;  %s176_s29 = scalar_lea.sflag [#allocation4], %s175_s10 }
  0x31   : > { %s837_s30 = scalar_lea.vmem %s190_s27, 128  ;;  %s912_s4 = smov [#allocation3]  }
  0x32   : > { %p826_p13 = pneg %p1026_p7  ;;  %p838_p0 = scmp.ne.s32.totalorder %s190_s27, %s837_s30 }
  0x33   : > { %s842_s5 = sshll.u32 %s912_s4, 4  ;;  %s843_s5 = int_to_ptr.vmem [resolvable:$false] %s842_s5 }
  0x34   : > { %p840_p2 = pnand %p838_p0, %p826_p13  ;;  %s844_s6 = scalar_lea.vmem %s843_s5, 256 }
  0x35   : > { %p845_p6 = scmp.lt.s32.totalorder %s190_s27, %s843_s5  ;;  %p846_p9 = scmp.lt.s32.totalorder %s844_s6, %s837_s30 }
  0x36   : > { %p841_p3 = pneg %p840_p2 }
  0x37   : > { %p847_p10 = por %p846_p9, %p845_p6 }
  0x39   : > { %p848_p1 = pnand %p847_p10, %p841_p3 }
  0x3b   : > { %851 = shalt.err (!%p848_p1)
}
  0x3c   : > { %713 = dma.hbm_to_vmem [thread:$0]  (!%p1026_p7), %s187_s25, 128, %s190_s27, %s176_s29  }
  0x3d   : > { %p1093_p4 = scmp.ne.s32.totalorder %s1090_s21, 0 }
  0x3e   : > { %s200_s7 = sand.u32 (!%p1093_p4), 1, %s890_s13   ;;  %p1094_p5 = scmp.ne.s32.totalorder (!%p1093_p4), %s1089_s20, 0 }
  0x3f   : > { %198 = sbr.rel (%p1093_p4) target bundleno = 510 (0x1fe), region = 32  ;;  %s1037_s9 = sshll.u32 (!%p1093_p4), %s200_s7, 3 }
  0x40   : > { %s201_s10 = scalar_lea.sflag (!%p1093_p4), [#allocation4], %s200_s7  ;;  %s204_s11 = scalar_lea.vmem (!%p1093_p4), [#allocation3], %s1037_s9 }
  0x44   : > { %877 = dma.done.wait (%p1094_p5), %s201_s10, 128  }
  0x45   : > { %879 = vsyncadd (%p1094_p5), %s201_s10, 4294967168  ;;  %p1095_p8 = scmp.ne.s32.totalorder %s1088_s19, 0 }
  0x47   : > { %881 = dma.done.wait (%p1095_p8), [#allocation6], 320  }
  0x48   : > { %883 = vsyncadd (%p1095_p8), [#allocation6], 4294966976  ;;  %v249_v0 = vlaneseq  ;;  %vm242_vm0 = vcmask 27648   ;;  %v913_v1 = vmov 0.0   ;;  %v247_v9 = vld [vmem:[#allocation5] sm:$0x77] }
  0x49   : > { %243 = vst.msk [vmem:[#allocation2] sm:$0xf] %vm242_vm0, %v913_v1  ;;  %244 = vst.msk [vmem:[#allocation2 + $0x4] sm:$0xf] %vm242_vm0, %v913_v1  ;;  %v246_v20 = vld [vmem:[%s204_s11] sm:$0xff]  ;;  %p235_p11 = scmp.lt.s32.totalorder %s898_s15, 1 }
  0x4a   : > { %245 = vst.msk [vmem:[#allocation2 + $0x8] sm:$0xf] %vm242_vm0, %v913_v1  ;;  %v250_v2 = vshrl.u32 %v249_v0, 7  ;;  %v558_v44 = vld [vmem:[#allocation7] sm:$0xf]  ;;  %vm582_vm1 = vcmask 0  }
  0x4b   : > { %v559_v47 = vld [vmem:[#allocation7 + $0x4] sm:$0xf]  ;;  %v560_v53 = vld [vmem:[#allocation7 + $0x8] sm:$0xf]  ;;  %s1104_s15 = smov (!%p235_p11, %s898_s15), 1 }
  0x4c   : > { %v251_v3 = vsub.s32 0, %v250_v2  ;;  %v255_v4 = vsub.s32 4, %v250_v2  ;;  %v351_v5 = vsub.s32 1, %v250_v2  ;;  %v355_v6 = vsub.s32 5, %v250_v2  ;;  %s237_s21 = scalar_lea.vmem %s1083_s3, %s1104_s15 }
  0x4d   : > { %v451_v7 = vsub.s32 2, %v250_v2  ;;  %v455_v8 = vsub.s32 6, %v250_v2 }
  0x4e   : > { %v252_v10 = vrot.slane %v247_v9, %v251_v3  ;;  %v256_v11 = vrot.slane %v247_v9, %v255_v4  ;;  %v352_v12 = vrot.slane %v247_v9, %v351_v5  ;;  %v356_v13 = vrot.slane %v247_v9, %v355_v6 }
  0x4f   : > { %v452_v14 = vrot.slane %v247_v9, %v451_v7  ;;  %v456_v15 = vrot.slane %v247_v9, %v455_v8 }
  0x50   : > { %v262_v16 = vrot.slane %v252_v10, %v251_v3  ;;  %v266_v17 = vrot.slane %v256_v11, %v251_v3  ;;  %v362_v18 = vrot.slane %v352_v12, %v351_v5  ;;  %v366_v19 = vrot.slane %v356_v13, %v351_v5  ;;  %v272_v32 = vld [vmem:[#allocation2] sm:$0xf]  ;;  %v373_v33 = vld [vmem:[#allocation2 + $0x4] sm:$0xf] }
  0x51   : > { %v462_v21 = vrot.slane %v452_v14, %v451_v7  ;;  %v466_v22 = vrot.slane %v456_v15, %v451_v7  ;;  %v473_v40 = vld [vmem:[#allocation2 + $0x8] sm:$0xf] }
  0x52   : > { %v269_v23 = vcombine.low %v262_v16, %v266_v17  ;;  %v369_v24 = vcombine.low %v362_v18, %v366_v19 }
  0x53   : > { %v469_v25 = vcombine.low %v462_v21, %v466_v22 }
  0x54   : > { %v271_v26 = vmul.f32 %v269_v23, %v246_v20  ;;  %v371_v27 = vmul.f32 %v369_v24, %v246_v20 }
  0x55   : > { %v471_v28 = vmul.f32 %v469_v25, %v246_v20 }
  0x56   : > { %v274_v29 = vcombine.high %v271_v26, %v271_v26  ;;  %v375_v30 = vcombine.high %v371_v27, %v371_v27 }
  0x57   : > { %v475_v31 = vcombine.high %v471_v28, %v471_v28 }
  0x58   : > { %306 = vmatprep.subr.mxu0 %v274_v29  ;;  %407 = vmatprep.subr.mxu1 %v375_v30 }
  0x59   : > { %307 = vmatpush1.xpose.msra.mxu0 %v271_v26  ;;  %408 = vmatpush1.xpose.msra.mxu1 %v371_v27 }
  0x5a   : > { %340 = vmatprep.mubr.f32.mxu0 %v274_v29  ;;  %441 = vmatprep.mubr.f32.mxu1 %v375_v30 }
  0x5b   : > { %507 = vmatprep.subr.mxu0 %v475_v31 }
  0x5c   : > { %341 = vmatmul.mubr.f32.vlgmr.msra.gmra.mxu0 %v271_v26  ;;  %442 = vmatmul.mubr.f32.vlgmr.msra.gmra.mxu1 %v371_v27 }
  0x5d   : > { %508 = vmatpush1.xpose.msra.mxu0 %v471_v28  ;;  %541 = vmatprep.mubr.f32.mxu0 %v475_v31 }
  0x60   : > { %542 = vmatmul.mubr.f32.vlgmr.msra.gmra.mxu0 %v471_v28 }
 0x11c   : > { %v342_v34 = vpop.f32.mrf.mxu0  ;;  %v443_v35 = vpop.f32.mrf.mxu1 }
 0x11d   : > { %v346_v36 = vadd.f32 %v342_v34, %v272_v32  ;;  %v447_v37 = vadd.f32 %v443_v35, %v373_v33 }
 0x11e   : > { %v344_v38 = vpop.f32.mrf.mxu0  ;;  %v445_v39 = vpop.f32.mrf.mxu1 }
 0x11f   : > { %348 = vst.msk [vmem:[#allocation2] sm:$0xf] %vm242_vm0, %v346_v36  ;;  %448 = vst.msk [vmem:[#allocation2 + $0x4] sm:$0xf] %vm242_vm0, %v447_v37 }
 0x120   : > { %v543_v41 = vpop.f32.mrf.mxu0 }
 0x121   : > { %v547_v42 = vadd.f32 %v543_v41, %v473_v40 }
 0x122   : > { %v545_v43 = vpop.f32.mrf.mxu0 }
 0x123   : > { %548 = vst.msk [vmem:[#allocation2 + $0x8] sm:$0xf] %vm242_vm0, %v547_v42 }
 0x126   : > { %v552_v45 = vld [vmem:[#allocation2] sm:$0xf]  ;;  %v553_v46 = vld [vmem:[#allocation2 + $0x4] sm:$0xf] }
 0x127   : > { %v555_v48 = vmul.f32 0.0009765625, %v552_v45  ;;  %v556_v49 = vmul.f32 0.0009765625, %v553_v46 }
 0x129   : > { %v561_v50 = vsub.f32 %v555_v48, %v558_v44  ;;  %v562_v51 = vsub.f32 %v556_v49, %v559_v47 }
 0x12a   : > { %v554_v52 = vld [vmem:[#allocation2 + $0x8] sm:$0xf] }
 0x12b   : > { %v557_v54 = vmul.f32 0.0009765625, %v554_v52  ;;  %v564_v55 = vmul.f32 %v561_v50, %v561_v50  ;;  %v565_v56 = vmul.f32 %v562_v51, %v562_v51 }
 0x12d   : > { %v563_v57 = vsub.f32 %v557_v54, %v560_v53  ;;  %v567_v58 = vsel %vm242_vm0, %v564_v55, 0.0  ;;  %v568_v59 = vsel %vm242_vm0, %v565_v56, 0.0 }
 0x12e   : > { %v569_v61 = vadd.f32 %v568_v59, %v567_v58 }
 0x12f   : > { %v566_v60 = vmul.f32 %v563_v57, %v563_v57 }
 0x131   : > { %v570_v62 = vsel %vm242_vm0, %v566_v60, 0.0 }
 0x132   : > { %v571_v63 = vadd.f32 %v570_v62, %v569_v61 }
 0x134   : > { %572 = vadd.xlane.f32.xlu0 %v571_v63 }
 0x1bd   : > { %v573_v0 = vpop.xlane.xlu0 %572 }
 0x1be   : > { %v574_v1 = vrot.slane %v573_v0, 4 }
 0x1c0   : > { %v575_v2 = vadd.f32 %v574_v1, %v573_v0 }
 0x1c2   : > { %v576_v3 = vrot.slane %v575_v2, 2 }
 0x1c4   : > { %v577_v4 = vadd.f32 %v576_v3, %v575_v2 }
 0x1c6   : > { %v578_v5 = vrot.slane %v577_v4, 1 }
 0x1c8   : > { %v579_v6 = vadd.f32 %v578_v5, %v577_v4 }
 0x1ca   : > { %691 = vpush %v579_v6 }
 0x1fb   : > { %s692_s12 = spop %691 }
 0x1fc   : > { %v581_v7 = vstv %s692_s12 }
 0x1fd   : > { %583 = vst.msk [vmem:[%s237_s21] sm:$0x1] %vm582_vm1, %v581_v7 }
 0x1fe PF: > { %s17_s17 = sadd.s32 1, %s906_s17   ;;  %s1096_s12 = smov %s890_s13 }
 0x1ff   : > { %p14_p12 = scmp.ge.s32.totalorder %s17_s17, 4   ;;  %s1097_s13 = smov %s894_s14 }
 0x200   : > { %s1098_s14 = smov %s1019_s22  ;;  %s1099_s15 = smov %s902_s16 }
 0x201   : > { %s1100_s16 = smov %s1102_s8  ;;  %16 = sbr.rel (!%p14_p12) target bundleno = 5 (0x5), region = 91 }
 0x206   :  { %601 = vsyncpa [#allocation4], 1 }
 0x207   :  { %603 = vsyncpa [#allocation4 + $0x1], 1 }
 0x208   :  { %604 = vsyncpa [#allocation6], 1 }

</bundles_post_ra>
